<compile_context>
chip_gen: v7x
topology: tpu7x:2x2x1
jax: 0.10.0
libtpu: 0.0.40
codegen_flags: <defaults>
</compile_context>

<pallas_src>
import functools

import jax
import jax.numpy as jnp
from jax.experimental import pallas as pl
from jax.experimental.pallas import tpu as pltpu


def _wce_kernel(pred_ref, gt_ref, out_ref, nfg_ref, sfg_ref, sbg_ref, *,
                hw_total):
    """Grid = (row blocks [parallel], HW chunks [arbitrary, reduction last]).

    pred_ref, gt_ref : (tb, tk) VMEM tiles in the input's native dtype
    out_ref          : (tb, 1)  f32 per-row loss, written at the last HW chunk
    nfg/sfg/sbg_ref  : (tb, 1)  f32 VMEM running partial sums over HW
    """
    k = pl.program_id(1)

    @pl.when(k == 0)
    def _init():
        nfg_ref[...] = jnp.zeros_like(nfg_ref)
        sfg_ref[...] = jnp.zeros_like(sfg_ref)
        sbg_ref[...] = jnp.zeros_like(sbg_ref)

    eps = jnp.float32(1e-16)
    pred = pred_ref[...].astype(jnp.float32)
    gt = gt_ref[...].astype(jnp.float32)
    one_minus_gt = 1.0 - gt

    nfg_ref[...] += jnp.sum(gt, axis=1, keepdims=True)
    sfg_ref[...] += jnp.sum(jnp.log(pred + eps) * gt, axis=1, keepdims=True)
    sbg_ref[...] += jnp.sum(jnp.log(1.0 - pred + eps) * one_minus_gt,
                            axis=1, keepdims=True)

    @pl.when(k == pl.num_programs(1) - 1)
    def _finalize():
        n_fg = nfg_ref[...]
        # sum(1 - gt) == HW - sum(gt): avoids a second full-tile reduction.
        n_bg = jnp.float32(hw_total) - n_fg
        # NOTE: matches the PyTorch module exactly — a plane with n_fg == 0 or
        # n_bg == 0 produces inf/NaN, same as the reference.
        out_ref[...] = -sfg_ref[...] / n_fg - sbg_ref[...] / n_bg


def _pick_tiles(B, HW, itemsize):
    """VMEM-budget-driven tile sizes (tb rows, tk spatial lanes)."""
    try:
        vmem_cap = int(pltpu.get_tpu_info().vmem_capacity_bytes)
    except Exception:
        vmem_cap = 64 * 1024 * 1024  # conservative: v7x per-TensorCore VMEM
    # Per-(input, buffer) tile target; pred+gt double-buffered => 4x this.
    tile_target = max(1 << 20, min(4 << 20, vmem_cap // 32))

    # Lane (spatial) tile: multiple of 128 dividing HW, or the full row.
    if HW % 128 == 0:
        tk_cap = max(128, tile_target // (8 * itemsize))
        tk = 128
        d = 128
        while d <= min(HW, tk_cap):
            if HW % d == 0:
                tk = d
            d += 128
    else:
        tk = HW  # full-extent last dim is always layout-legal

    # Sublane (row) tile: multiple of 8 dividing B, sized to the byte budget.
    if B % 8 == 0:
        tb_cap = max(8, (tile_target // (tk * itemsize)) // 8 * 8)
        tb = 8
        d = 8
        while d <= min(B, tb_cap):
            if B % d == 0:
                tb = d
            d += 8
    else:
        # TODO(synk): B not a multiple of 8 falls back to one full-extent row
        # block; fine for small B, could exceed VMEM for huge non-8-multiple B.
        tb = B
    return tb, tk


def wce_loss(pred, gt):
    """Pallas implementation of WCE_loss.forward(pred, gt) for NCHW inputs."""
    N, C, H, W = pred.shape
    assert gt.shape == pred.shape
    B, HW = N * C, H * W

    # Keep the native dtype (no wrapper-side f32 materialization); the kernel
    # upcasts each tile to f32 inside VMEM.
    pred2 = pred.reshape(B, HW)
    gt2 = gt.reshape(B, HW)

    itemsize = max(jnp.dtype(pred2.dtype).itemsize,
                   jnp.dtype(gt2.dtype).itemsize)
    tb, tk = _pick_tiles(B, HW, itemsize)
    grid = (B // tb, HW // tk)

    # 2 inputs x 2 pipeline buffers + scratch/output + margin.
    needed = 4 * tb * tk * itemsize + 4 * tb * 4 + (1 << 20)
    vmem_limit = int(min(max(needed, 16 << 20), 64 << 20))

    kernel = functools.partial(_wce_kernel, hw_total=HW)

    per_row = pl.pallas_call(
        kernel,
        out_shape=jax.ShapeDtypeStruct((B, 1), jnp.float32),
        grid_spec=pltpu.PrefetchScalarGridSpec(
            num_scalar_prefetch=0,
            grid=grid,
            in_specs=[
                pl.BlockSpec((tb, tk), lambda i, k: (i, k)),
                pl.BlockSpec((tb, tk), lambda i, k: (i, k)),
            ],
            out_specs=pl.BlockSpec((tb, 1), lambda i, k: (i, 0)),
            scratch_shapes=[
                pltpu.VMEM((tb, 1), jnp.float32),  # n_fg partial
                pltpu.VMEM((tb, 1), jnp.float32),  # sum(log(pred+eps)*gt)
                pltpu.VMEM((tb, 1), jnp.float32),  # sum(log(1-pred+eps)*(1-gt))
            ],
        ),
        compiler_params=pltpu.CompilerParams(
            dimension_semantics=("parallel", "arbitrary"),
            vmem_limit_bytes=vmem_limit,
        ),
        cost_estimate=pl.CostEstimate(
            flops=6 * B * HW,
            transcendentals=2 * B * HW,
            bytes_accessed=2 * B * HW * itemsize + B * 4,
        ),
    )(pred2, gt2)

    # torch.mean(L) over the (N, C) planes.
    return jnp.mean(per_row)


def wce_loss_ref(pred, gt):
    """Pure-JAX reference mirroring the PyTorch module exactly."""
    eps = jnp.float32(1e-16)
    sum_ij = lambda x: jnp.sum(x, axis=(2, 3))
    n_fg = sum_ij(gt)
    n_bg = sum_ij(1.0 - gt)
    l_fg = -sum_ij(jnp.log(pred + eps) * gt) / n_fg
    l_bg = -sum_ij(jnp.log(1.0 - pred + eps) * (1.0 - gt)) / n_bg
    return jnp.mean(l_fg + l_bg)


if __name__ == "__main__":
    key = jax.random.PRNGKey(0)
    kp, kg = jax.random.split(key)

    N, C, H, W = 2, 4, 16, 16
    # pred: probabilities in (0, 1); gt: soft mask in [0, 1]
    pred = jax.random.uniform(kp, (N, C, H, W), dtype=jnp.float32,
                              minval=0.01, maxval=0.99)
    gt = jax.random.uniform(kg, (N, C, H, W), dtype=jnp.float32)

    loss = jax.block_until_ready(wce_loss(pred, gt))
    ref = jax.block_until_ready(wce_loss_ref(pred, gt))

    assert jnp.isfinite(loss), f"non-finite loss: {loss}"
    assert jnp.allclose(loss, ref, rtol=1e-5, atol=1e-5), (loss, ref)
    print("KERNEL_OK")
</pallas_src>

<mosaic_0001>
module attributes {stable_mosaic.version = 11 : i64} {
  func.func @_wce_kernel(%arg0: i32, %arg1: i32, %arg2: memref<8x256xf32, #tpu.memory_space<vmem>>, %arg3: memref<8x256xf32, #tpu.memory_space<vmem>>, %arg4: memref<8x1xf32, #tpu.memory_space<vmem>>, %arg5: memref<8x1xf32, #tpu.memory_space<vmem>>, %arg6: memref<8x1xf32, #tpu.memory_space<vmem>>, %arg7: memref<8x1xf32, #tpu.memory_space<vmem>>) attributes {dimension_semantics = [#tpu.dimension_semantics<parallel>, #tpu.dimension_semantics<arbitrary>], iteration_bounds = array<i64: 1, 1>, scalar_prefetch = 0 : i64, scratch_operands = 3 : i64, tpu.core_type = #tpu.core_type<tc>, window_params = [{transform_indices = @transform_0, window_bounds = array<i64: 8, 256>}, {transform_indices = @transform_1, window_bounds = array<i64: 8, 256>}, {transform_indices = @transform_2, window_bounds = array<i64: 8, 1>}]} {
    %c0_i32 = arith.constant 0 : i32
    %0 = arith.cmpi eq, %arg1, %c0_i32 : i32
    %1 = arith.extui %0 : i1 to i32
    %c0_i32_0 = arith.constant 0 : i32
    %2 = arith.cmpi ne, %1, %c0_i32_0 : i32
    scf.if %2 {
      %cst_24 = arith.constant 0.000000e+00 : f32
      %35 = vector.broadcast %cst_24 : f32 to vector<8x1xf32>
      %c0_25 = arith.constant 0 : index
      %c0_26 = arith.constant 0 : index
      %36 = vector.load %arg5[%c0_25, %c0_26] : memref<8x1xf32, #tpu.memory_space<vmem>>, vector<8x1xf32>
      tpu.vector_store %arg5[%c0_25, %c0_26], %35 {strides = array<i32>} : memref<8x1xf32, #tpu.memory_space<vmem>>, vector<8x1xf32>,
      %cst_27 = arith.constant 0.000000e+00 : f32
      %37 = vector.broadcast %cst_27 : f32 to vector<8x1xf32>
      %c0_28 = arith.constant 0 : index
      %c0_29 = arith.constant 0 : index
      %38 = vector.load %arg6[%c0_28, %c0_29] : memref<8x1xf32, #tpu.memory_space<vmem>>, vector<8x1xf32>
      tpu.vector_store %arg6[%c0_28, %c0_29], %37 {strides = array<i32>} : memref<8x1xf32, #tpu.memory_space<vmem>>, vector<8x1xf32>,
      %cst_30 = arith.constant 0.000000e+00 : f32
      %39 = vector.broadcast %cst_30 : f32 to vector<8x1xf32>
      %c0_31 = arith.constant 0 : index
      %c0_32 = arith.constant 0 : index
      %40 = vector.load %arg7[%c0_31, %c0_32] : memref<8x1xf32, #tpu.memory_space<vmem>>, vector<8x1xf32>
      tpu.vector_store %arg7[%c0_31, %c0_32], %39 {strides = array<i32>} : memref<8x1xf32, #tpu.memory_space<vmem>>, vector<8x1xf32>,
    } else {
    }
    %c0 = arith.constant 0 : index
    %c0_1 = arith.constant 0 : index
    %3 = vector.load %arg2[%c0, %c0_1] : memref<8x256xf32, #tpu.memory_space<vmem>>, vector<8x256xf32>
    %c0_2 = arith.constant 0 : index
    %c0_3 = arith.constant 0 : index
    %4 = vector.load %arg3[%c0_2, %c0_3] : memref<8x256xf32, #tpu.memory_space<vmem>>, vector<8x256xf32>
    %cst = arith.constant 1.000000e+00 : f32
    %5 = vector.broadcast %cst : f32 to vector<8x256xf32>
    %6 = arith.subf %5, %4 : vector<8x256xf32>
    %c0_4 = arith.constant 0 : index
    %c0_5 = arith.constant 0 : index
    %7 = vector.load %arg5[%c0_4, %c0_5] : memref<8x1xf32, #tpu.memory_space<vmem>>, vector<8x1xf32>
    %cst_6 = arith.constant dense<0.000000e+00> : vector<8xf32>
    %8 = vector.multi_reduction <add>, %4, %cst_6 [1] : vector<8x256xf32> to vector<8xf32>
    %9 = vector.shape_cast %8 : vector<8xf32> to vector<8x1xf32>
    %10 = arith.addf %7, %9 : vector<8x1xf32>
    %c0_7 = arith.constant 0 : index
    %c0_8 = arith.constant 0 : index
    %11 = vector.load %arg5[%c0_7, %c0_8] : memref<8x1xf32, #tpu.memory_space<vmem>>, vector<8x1xf32>
    tpu.vector_store %arg5[%c0_7, %c0_8], %10 {strides = array<i32>} : memref<8x1xf32, #tpu.memory_space<vmem>>, vector<8x1xf32>,
    %c0_9 = arith.constant 0 : index
    %c0_10 = arith.constant 0 : index
    %12 = vector.load %arg6[%c0_9, %c0_10] : memref<8x1xf32, #tpu.memory_space<vmem>>, vector<8x1xf32>
    %cst_11 = arith.constant 1.000000e-16 : f32
    %13 = vector.broadcast %cst_11 : f32 to vector<8x256xf32>
    %14 = arith.addf %3, %13 : vector<8x256xf32>
    %15 = math.log %14 : vector<8x256xf32>
    %16 = arith.mulf %15, %4 : vector<8x256xf32>
    %cst_12 = arith.constant dense<0.000000e+00> : vector<8xf32>
    %17 = vector.multi_reduction <add>, %16, %cst_12 [1] : vector<8x256xf32> to vector<8xf32>
    %18 = vector.shape_cast %17 : vector<8xf32> to vector<8x1xf32>
    %19 = arith.addf %12, %18 : vector<8x1xf32>
    %c0_13 = arith.constant 0 : index
    %c0_14 = arith.constant 0 : index
    %20 = vector.load %arg6[%c0_13, %c0_14] : memref<8x1xf32, #tpu.memory_space<vmem>>, vector<8x1xf32>
    tpu.vector_store %arg6[%c0_13, %c0_14], %19 {strides = array<i32>} : memref<8x1xf32, #tpu.memory_space<vmem>>, vector<8x1xf32>,
    %c0_15 = arith.constant 0 : index
    %c0_16 = arith.constant 0 : index
    %21 = vector.load %arg7[%c0_15, %c0_16] : memref<8x1xf32, #tpu.memory_space<vmem>>, vector<8x1xf32>
    %cst_17 = arith.constant 1.000000e+00 : f32
    %22 = vector.broadcast %cst_17 : f32 to vector<8x256xf32>
    %23 = arith.subf %22, %3 : vector<8x256xf32>
    %cst_18 = arith.constant 1.000000e-16 : f32
    %24 = vector.broadcast %cst_18 : f32 to vector<8x256xf32>
    %25 = arith.addf %23, %24 : vector<8x256xf32>
    %26 = math.log %25 : vector<8x256xf32>
    %27 = arith.mulf %26, %6 : vector<8x256xf32>
    %cst_19 = arith.constant dense<0.000000e+00> : vector<8xf32>
    %28 = vector.multi_reduction <add>, %27, %cst_19 [1] : vector<8x256xf32> to vector<8xf32>
    %29 = vector.shape_cast %28 : vector<8xf32> to vector<8x1xf32>
    %30 = arith.addf %21, %29 : vector<8x1xf32>
    %c0_20 = arith.constant 0 : index
    %c0_21 = arith.constant 0 : index
    %31 = vector.load %arg7[%c0_20, %c0_21] : memref<8x1xf32, #tpu.memory_space<vmem>>, vector<8x1xf32>
    tpu.vector_store %arg7[%c0_20, %c0_21], %30 {strides = array<i32>} : memref<8x1xf32, #tpu.memory_space<vmem>>, vector<8x1xf32>,
    %c0_i32_22 = arith.constant 0 : i32
    %32 = arith.cmpi eq, %arg1, %c0_i32_22 : i32
    %33 = arith.extui %32 : i1 to i32
    %c0_i32_23 = arith.constant 0 : i32
    %34 = arith.cmpi ne, %33, %c0_i32_23 : i32
    scf.if %34 {
      %c0_24 = arith.constant 0 : index
      %c0_25 = arith.constant 0 : index
      %35 = vector.load %arg5[%c0_24, %c0_25] : memref<8x1xf32, #tpu.memory_space<vmem>>, vector<8x1xf32>
      %cst_26 = arith.constant 2.560000e+02 : f32
      %36 = vector.broadcast %cst_26 : f32 to vector<8x1xf32>
      %37 = arith.subf %36, %35 : vector<8x1xf32>
      %c0_27 = arith.constant 0 : index
      %c0_28 = arith.constant 0 : index
      %38 = vector.load %arg6[%c0_27, %c0_28] : memref<8x1xf32, #tpu.memory_space<vmem>>, vector<8x1xf32>
      %cst_29 = arith.constant 0.000000e+00 : f32
      %39 = vector.broadcast %cst_29 : f32 to vector<8x1xf32>
      %40 = arith.subf %39, %38 : vector<8x1xf32>
      %41 = arith.divf %40, %35 : vector<8x1xf32>
      %c0_30 = arith.constant 0 : index
      %c0_31 = arith.constant 0 : index
      %42 = vector.load %arg7[%c0_30, %c0_31] : memref<8x1xf32, #tpu.memory_space<vmem>>, vector<8x1xf32>
      %43 = arith.divf %42, %37 : vector<8x1xf32>
      %44 = arith.subf %41, %43 : vector<8x1xf32>
      %c0_32 = arith.constant 0 : index
      %c0_33 = arith.constant 0 : index
      %45 = vector.load %arg4[%c0_32, %c0_33] : memref<8x1xf32, #tpu.memory_space<vmem>>, vector<8x1xf32>
      tpu.vector_store %arg4[%c0_32, %c0_33], %44 {strides = array<i32>} : memref<8x1xf32, #tpu.memory_space<vmem>>, vector<8x1xf32>,
    } else {
    }
    return
  }
  func.func @transform_0(%arg0: i32, %arg1: i32) -> (i32, i32) {
    %c0_i32 = arith.constant 0 : i32
    return %arg0, %arg1 : i32, i32
  }
  func.func @transform_1(%arg0: i32, %arg1: i32) -> (i32, i32) {
    %c0_i32 = arith.constant 0 : i32
    return %arg0, %arg1 : i32, i32
  }
  func.func @transform_2(%arg0: i32, %arg1: i32) -> (i32, i32) {
    %c0_i32 = arith.constant 0 : i32
    %c0_i32_0 = arith.constant 0 : i32
    return %arg0, %c0_i32 : i32, i32
  }
}

</mosaic_0001>

<bundles_post_ra>
// kernel: tpu_custom_call.1
= control target key start
LH: loop header
LB: loop body
LE: loop exit
PB: predicated region body
PF: predicated region fallthrough
CT: control target
= control target key end

     0   :  { %7 = vsyncpa [#allocation6], 0  ;;  %s221_s0 = inlined_call_operand.hbm [shape: f32[8,256], index: 0, kind: input, shape index: {}]   ;;  %s222_s1 = inlined_call_operand.hbm [shape: f32[8,256], index: 1, kind: input, shape index: {}]   ;;  %s223_s2 = inlined_call_operand.vmem [shape: f32[8,1], index: 2, kind: output, shape index: {}]  }
   0x1   :  { %8 = vsyncpa [#allocation8], 0  ;;  %s169_s9 = smov [#allocation5]   ;;  %s170_s11 = smov [#allocation7]  }
   0x2   :  { %s15_s10 = sshll.u32 %s169_s9, 4  ;;  %s25_s12 = sshll.u32 %s170_s11, 4  ;;  %s16_s10 = int_to_ptr.vmem [resolvable:$true] %s15_s10  ;;  %s26_s12 = int_to_ptr.vmem [resolvable:$true] %s25_s12 }
   0x3   :  { %s121_s15 = scalar_lea.hbm %s221_s0, 256 }
   0x4   :  { %p122_p0 = scmp.ne.s32.totalorder %s221_s0, %s121_s15  ;;  %p125_p1 = scmp.lt.u32.totalorder %s121_s15, %s221_s0 }
   0x6   :  { %p127_p2 = pnand %p125_p1, %p122_p0 }
   0x8   :  { %130 = shalt.err (!%p127_p2)
}
   0x9   :  { %s131_s20 = scalar_lea.vmem %s16_s10, 256  ;;  %p136_p4 = scmp.lt.s32.totalorder %s16_s10, %s16_s10 }
   0xa   :  { %p132_p3 = scmp.ne.s32.totalorder %s16_s10, %s131_s20  ;;  %p137_p5 = scmp.lt.s32.totalorder %s131_s20, %s131_s20 }
   0xc   :  { %p138_p6 = por %p137_p5, %p136_p4 }
   0xe   :  { %p139_p7 = pnand %p138_p6, %p132_p3 }
  0x10   :  { %142 = shalt.err (!%p139_p7)
}
  0x11   :  { %18 = dma.hbm_to_vmem [thread:$0]  %s221_s0, 256, %s16_s10, [#allocation6]  }
  0x12   :  { %s143_s25 = scalar_lea.hbm %s222_s1, 256 }
  0x13   :  { %p144_p8 = scmp.ne.s32.totalorder %s222_s1, %s143_s25  ;;  %p147_p9 = scmp.lt.u32.totalorder %s143_s25, %s222_s1 }
  0x15   :  { %p149_p10 = pnand %p147_p9, %p144_p8 }
  0x17   :  { %152 = shalt.err (!%p149_p10)
}
  0x18   :  { %s153_s30 = scalar_lea.vmem %s26_s12, 256  ;;  %p158_p12 = scmp.lt.s32.totalorder %s26_s12, %s26_s12 }
  0x19   :  { %p154_p11 = scmp.ne.s32.totalorder %s26_s12, %s153_s30  ;;  %p159_p13 = scmp.lt.s32.totalorder %s153_s30, %s153_s30 }
  0x1b   :  { %p160_p0 = por %p159_p13, %p158_p12 }
  0x1d   :  { %p161_p1 = pnand %p160_p0, %p154_p11 }
  0x1f   :  { %164 = shalt.err (!%p161_p1)
}
  0x20   :  { %28 = dma.hbm_to_vmem [thread:$0]  %s222_s1, 256, %s26_s12, [#allocation8]  }
  0x21   :  { %165 = dma.done.wait [#allocation6], 256  }
  0x22   :  { %166 = vsyncadd [#allocation6], 4294967040 }
  0x23   :  { %167 = dma.done.wait [#allocation8], 256  }
  0x24   :  { %168 = vsyncadd [#allocation8], 4294967040  ;;  %vm39_vm0 = vcmask 7168   ;;  %v171_v0 = vmov 0.0   ;;  %v45_v1 = vld [vmem:[#allocation7] sm:$0xff]  ;;  %v46_v2 = vld [vmem:[#allocation7 + $0x8] sm:$0xff] }
  0x25   :  { %40 = vst.msk [vmem:[#allocation2] sm:$0xff] %vm39_vm0, %v171_v0  ;;  %41 = vst.msk [vmem:[#allocation3] sm:$0xff] %vm39_vm0, %v171_v0  ;;  %v43_v3 = vld [vmem:[#allocation5] sm:$0xff]  ;;  %v50_v4 = vadd.f32 %v46_v2, %v45_v1  ;;  %v44_v5 = vld [vmem:[#allocation5 + $0x8] sm:$0xff]  ;;  %v47_v16 = vsub.f32 1.0, %v45_v1  ;;  %v48_v19 = vsub.f32 1.0, %v46_v2 }
  0x26   :  { %42 = vst.msk [vmem:[#allocation4] sm:$0xff] %vm39_vm0, %v171_v0  ;;  %v57_v6 = vadd.f32 1e-16, %v43_v3  ;;  %v58_v7 = vadd.f32 1e-16, %v44_v5  ;;  %v71_v8 = vsub.f32 1.0, %v43_v3 }
  0x27   :  { %v72_v9 = vsub.f32 1.0, %v44_v5  ;;  %51 = vadd.xlane.f32.xlu0 %v50_v4 }
  0x28   :  { %109 = vlog2.f32 %v57_v6  ;;  %v73_v10 = vadd.f32 1e-16, %v71_v8 }
  0x29   :  { %111 = vlog2.f32 %v58_v7  ;;  %v74_v11 = vadd.f32 1e-16, %v72_v9 }
  0x2a   :  { %113 = vlog2.f32 %v73_v10 }
  0x2b   :  { %115 = vlog2.f32 %v74_v11 }
  0x2c   :  { %v49_v28 = vld [vmem:[#allocation2] sm:$0xff]  ;;  %v56_v33 = vld [vmem:[#allocation3] sm:$0xff] }
  0x2d   :  { %v70_v36 = vld [vmem:[#allocation4] sm:$0xff] }
  0x32   :  { %v110_v12 = vpop.eup %109 }
  0x33   :  { %v112_v13 = vpop.eup %111  ;;  %v60_v14 = vmul.f32 0.6931472, %v110_v12 }
  0x34   :  { %v62_v15 = vmul.f32 0.6931472, %v112_v13  ;;  %v114_v17 = vpop.eup %113 }
  0x35   :  { %v63_v18 = vmul.f32 %v60_v14, %v45_v1  ;;  %v116_v20 = vpop.eup %115  ;;  %v76_v22 = vmul.f32 0.6931472, %v114_v17 }
  0x36   :  { %v64_v21 = vmul.f32 %v62_v15, %v46_v2  ;;  %v78_v23 = vmul.f32 0.6931472, %v116_v20 }
  0x37   :  { %v79_v25 = vmul.f32 %v76_v22, %v47_v16 }
  0x38   :  { %v65_v24 = vadd.f32 %v64_v21, %v63_v18  ;;  %v80_v26 = vmul.f32 %v78_v23, %v48_v19 }
  0x3a   :  { %66 = vadd.xlane.f32.xlu0 %v65_v24  ;;  %v81_v27 = vadd.f32 %v80_v26, %v79_v25 }
  0x3c   :  { %82 = vadd.xlane.f32.xlu1 %v81_v27 }
  0xb4   :  { %v52_v29 = vpop.xlane.xlu0 %51 }
  0xb5   :  { %v53_v30 = vadd.f32 %v52_v29, %v49_v28 }
  0xb7   :  { %55 = vst.msk [vmem:[#allocation2] sm:$0xff] %vm39_vm0, %v53_v30 }
  0xbe   :  { %v89_v31 = vld [vmem:[#allocation2] sm:$0xff] }
  0xbf   :  { %v90_v32 = vsub.f32 256.0, %v89_v31 }
  0xc1   :  { %117 = vrcp.f32 %v90_v32 }
  0xc2   :  { %119 = vrcp.f32 %v89_v31 }
  0xc7   :  { %v67_v34 = vpop.xlane.xlu0 %66 }
  0xc8   :  { %v68_v35 = vadd.f32 %v67_v34, %v56_v33 }
  0xc9   :  { %v83_v37 = vpop.xlane.xlu1 %82 }
  0xca   :  { %69 = vst.msk [vmem:[#allocation3] sm:$0xff] %vm39_vm0, %v68_v35  ;;  %v84_v38 = vadd.f32 %v83_v37, %v70_v36 }
  0xcb   :  { %v118_v40 = vpop.eup %117 }
  0xcc   :  { %85 = vst.msk [vmem:[#allocation4] sm:$0xff] %vm39_vm0, %v84_v38  ;;  %v120_v42 = vpop.eup %119 }
  0xd1   :  { %v91_v39 = vld [vmem:[#allocation3] sm:$0xff] }
  0xd2   :  { %v92_v41 = vsub.f32 0.0, %v91_v39 }
  0xd3   :  { %v95_v44 = vld [vmem:[#allocation4] sm:$0xff] }
  0xd4   :  { %v94_v43 = vmul.f32 %v120_v42, %v92_v41  ;;  %v97_v45 = vmul.f32 %v118_v40, %v95_v44 }
  0xd6   :  { %v98_v46 = vsub.f32 %v94_v43, %v97_v45 }
  0xd8   :  { %99 = vst.msk [vmem:[%s223_s2] sm:$0xff] %vm39_vm0, %v98_v46 }
  0xd9   :  { %104 = vsyncpa [#allocation6], 1 }
  0xda   :  { %105 = vsyncpa [#allocation8], 1 }

</bundles_post_ra>
